<compile_context>
chip_gen: v6e
topology: v6e:2x2x1
jax: 0.10.0
libtpu: 0.0.40
codegen_flags: <defaults>
</compile_context>

<pallas_src>
import jax
import jax.numpy as jnp
from jax import lax
from jax.experimental import pallas as pl
from jax.experimental.pallas import tpu as pltpu

MATMUL_DTYPE = jnp.bfloat16  # MXU operand dtype (accumulation stays f32); jnp.float32 for exact f32


# ----------------------------------------------------------------------------
# Fused kernel: conv(im2col matmul) + 2x2x2 max-pool + channel logsumexp + ReLU
# ----------------------------------------------------------------------------
def _fused_kernel(p_ref, wt_ref, b_ref, o_ref):
    """p_ref : (1, 8, KP, NPT)  im2col patches, grouped by pooling-window position.
    wt_ref: (Cout, KP)        flattened conv weight (feature order = (kd,kh,kw,cin)).
    b_ref : (Cout, 1)  f32    bias column.
    o_ref : (1, 1, NPT) f32   relu(logsumexp_c(maxpool(conv)))."""
    wt = wt_ref[...]
    # conv at each of the 8 voxels of a 2x2x2 window, fused with the running max (= MaxPool3d)
    m = jnp.dot(wt, p_ref[0, 0], preferred_element_type=jnp.float32)          # (Cout, NPT)
    for p in range(1, p_ref.shape[1]):
        c = jnp.dot(wt, p_ref[0, p], preferred_element_type=jnp.float32)
        m = jnp.maximum(m, c)
    # bias is per-channel, so max(conv) + b == max(conv + b)
    m = m + b_ref[...]                                                        # (Cout, NPT) f32
    # numerically stable logsumexp over channels (sublane axis), then ReLU
    cmax = jnp.max(m, axis=0, keepdims=True)                                  # (1, NPT)
    lse = cmax + jnp.log(jnp.sum(jnp.exp(m - cmax), axis=0, keepdims=True))   # (1, NPT)
    o_ref[0] = jnp.maximum(lse, 0.0)


def _pick_col_tile(np_total: int) -> int:
    """Pooled voxels per grid step: multiple of 128 when possible (lane-dense, bounded VMEM),
    otherwise the full axis (BlockSpec requires full-dim or 128-divisible last dim)."""
    if np_total % 128 != 0:
        return np_total
    for t in (2048, 1024, 512, 256, 128):
        if np_total % t == 0:
            return t
    return np_total


def fused_conv_pool_lse_relu(patches, w_t, bias_col):
    """patches: (B, 8, KP, Np) MATMUL_DTYPE, w_t: (Cout, KP) MATMUL_DTYPE, bias_col: (Cout,1) f32.
    Returns (B, 1, Np) f32."""
    B, P, KP, Np = patches.shape
    Cout = w_t.shape[0]
    npt = _pick_col_tile(Np)
    grid = (B, Np // npt)
    return pl.pallas_call(
        _fused_kernel,
        out_shape=jax.ShapeDtypeStruct((B, 1, Np), jnp.float32),
        grid=grid,
        in_specs=[
            pl.BlockSpec((1, P, KP, npt), lambda b, j: (b, 0, 0, j)),
            pl.BlockSpec((Cout, KP), lambda b, j: (0, 0)),
            pl.BlockSpec((Cout, 1), lambda b, j: (0, 0)),
        ],
        out_specs=pl.BlockSpec((1, 1, npt), lambda b, j: (b, 0, j)),
        compiler_params=pltpu.CompilerParams(
            dimension_semantics=("parallel", "parallel")),
    )(patches, w_t, bias_col)


# ----------------------------------------------------------------------------
# Wrapper: im2col / layout glue in plain XLA, one fused Pallas call.
# ----------------------------------------------------------------------------
@jax.jit
def model_forward(x, weight, bias):
    """x: (B, Cin, D, H, W) f32, weight: (Cout, Cin, 3, 3, 3), bias: (Cout,).
    Returns (B, 1, D//2, H//2, W//2) f32 — same semantics as the PyTorch Model."""
    B, Cin, D, H, W = x.shape
    Cout, _, K, _, _ = weight.shape
    assert K == 3
    # TODO(synk): odd D/H/W would need MaxPool3d floor semantics; module's shapes are even.
    assert D % 2 == 0 and H % 2 == 0 and W % 2 == 0
    Dp, Hp, Wp = D // 2, H // 2, W // 2
    Np = Dp * Hp * Wp
    F = K * K * K * Cin
    KP = ((F + 127) // 128) * 128

    # NCDHW -> NDHWC, conv padding, cast matmul operand dtype
    x_ndhwc = jnp.transpose(x, (0, 2, 3, 4, 1))
    x_pad = jnp.pad(x_ndhwc, ((0, 0), (1, 1), (1, 1), (1, 1), (0, 0))).astype(MATMUL_DTYPE)

    # im2col: feature index f = ((kd*3+kh)*3+kw)*Cin + cin
    taps = [x_pad[:, kd:kd + D, kh:kh + H, kw:kw + W, :]
            for kd in range(K) for kh in range(K) for kw in range(K)]
    pat = jnp.concatenate(taps, axis=-1)                        # (B, D, H, W, F)
    # reorder rows into pooling-window-position-major, transpose to feature-major columns
    pat = pat.reshape(B, Dp, 2, Hp, 2, Wp, 2, F)
    pat = jnp.transpose(pat, (0, 2, 4, 6, 7, 1, 3, 5))          # (B, 2,2,2, F, Dp, Hp, Wp)
    pat = pat.reshape(B, 8, F, Np)
    pat = jnp.pad(pat, ((0, 0), (0, 0), (0, KP - F), (0, 0)))   # zero-pad contraction to KP

    # (Cout, Cin, kd, kh, kw) -> (Cout, F) in the same (kd,kh,kw,cin) feature order, pad to KP
    w_t = jnp.transpose(weight, (0, 2, 3, 4, 1)).reshape(Cout, F)
    w_t = jnp.pad(w_t, ((0, 0), (0, KP - F))).astype(MATMUL_DTYPE)
    bias_col = bias.reshape(Cout, 1).astype(jnp.float32)

    out = fused_conv_pool_lse_relu(pat, w_t, bias_col)          # (B, 1, Np) f32
    return out.reshape(B, 1, Dp, Hp, Wp)


# ----------------------------------------------------------------------------
# Pure-JAX reference for verification.
# ----------------------------------------------------------------------------
def reference(x, weight, bias):
    conv = lax.conv_general_dilated(
        x, weight, window_strides=(1, 1, 1),
        padding=((1, 1), (1, 1), (1, 1)),
        dimension_numbers=("NCDHW", "OIDHW", "NCDHW"),
    ) + bias.reshape(1, -1, 1, 1, 1)
    pooled = lax.reduce_window(
        conv, -jnp.inf, lax.max,
        window_dimensions=(1, 1, 2, 2, 2),
        window_strides=(1, 1, 2, 2, 2),
        padding="VALID",
    )
    lse = jax.scipy.special.logsumexp(pooled, axis=1, keepdims=True)
    return jnp.maximum(lse, 0.0)


if __name__ == "__main__":
    B, Cin, Cout = 2, 3, 16
    D = H = W = 8

    key = jax.random.PRNGKey(0)
    kx, kw, kb = jax.random.split(key, 3)

    x = jax.random.normal(kx, (B, Cin, D, H, W), dtype=jnp.float32)
    fan_in = Cin * 3 * 3 * 3
    bound = 1.0 / (fan_in ** 0.5)
    weight = jax.random.uniform(kw, (Cout, Cin, 3, 3, 3), jnp.float32, -bound, bound)
    bias = jax.random.uniform(kb, (Cout,), jnp.float32, -bound, bound)

    out = jax.block_until_ready(model_forward(x, weight, bias))
    assert out.shape == (B, 1, D // 2, H // 2, W // 2), out.shape

    # tight check against a reference whose conv operands are rounded to the matmul dtype
    xq = x.astype(MATMUL_DTYPE).astype(jnp.float32)
    wq = weight.astype(MATMUL_DTYPE).astype(jnp.float32)
    ref_q = jax.block_until_ready(reference(xq, wq, bias))
    assert jnp.allclose(out, ref_q, rtol=2e-3, atol=2e-3), float(jnp.max(jnp.abs(out - ref_q)))

    # looser sanity check against the full-f32 reference (bf16 matmul operands)
    ref = jax.block_until_ready(reference(x, weight, bias))
    assert jnp.allclose(out, ref, rtol=5e-2, atol=5e-2), float(jnp.max(jnp.abs(out - ref)))

    print("KERNEL_OK")
</pallas_src>

<mosaic_0001>
module attributes {stable_mosaic.version = 11 : i64} {
  func.func @_fused_kernel(%arg0: i32, %arg1: i32, %arg2: memref<1x8x128x64xbf16, #tpu.memory_space<vmem>>, %arg3: memref<16x128xbf16, #tpu.memory_space<vmem>>, %arg4: memref<16x1xf32, #tpu.memory_space<vmem>>, %arg5: memref<1x1x64xf32, #tpu.memory_space<vmem>>) attributes {dimension_semantics = [#tpu.dimension_semantics<parallel>, #tpu.dimension_semantics<parallel>], iteration_bounds = array<i64: 2, 1>, scalar_prefetch = 0 : i64, scratch_operands = 0 : i64, tpu.core_type = #tpu.core_type<tc>, window_params = [{transform_indices = @transform_0, window_bounds = array<i64: 1, 8, 128, 64>}, {pipeline_mode = #tpu.pipeline_mode<synchronous>, transform_indices = @transform_1, window_bounds = array<i64: 16, 128>}, {pipeline_mode = #tpu.pipeline_mode<synchronous>, transform_indices = @transform_2, window_bounds = array<i64: 16, 1>}, {transform_indices = @transform_3, window_bounds = array<i64: 1, 1, 64>}]} {
    %c0 = arith.constant 0 : index
    %c0_0 = arith.constant 0 : index
    %0 = vector.load %arg3[%c0, %c0_0] : memref<16x128xbf16, #tpu.memory_space<vmem>>, vector<16x128xbf16>
    %c0_1 = arith.constant 0 : index
    %c0_2 = arith.constant 0 : index
    %c0_3 = arith.constant 0 : index
    %c0_4 = arith.constant 0 : index
    %1 = vector.load %arg2[%c0_1, %c0_2, %c0_3, %c0_4] : memref<1x8x128x64xbf16, #tpu.memory_space<vmem>>, vector<1x1x128x64xbf16>
    %2 = vector.shape_cast %1 : vector<1x1x128x64xbf16> to vector<128x64xbf16>
    %cst = arith.constant dense<0.000000e+00> : vector<16x64xf32>
    %3 = tpu.matmul %0, %2, %cst {dimension_numbers = #tpu.dot_dimension_numbers<[1], [0], [0], [1], [0, 0, 1, 1], [], []>} : vector<16x128xbf16>, vector<128x64xbf16>, vector<16x64xf32> -> vector<16x64xf32>
    %c0_5 = arith.constant 0 : index
    %c1 = arith.constant 1 : index
    %c0_6 = arith.constant 0 : index
    %c0_7 = arith.constant 0 : index
    %4 = vector.load %arg2[%c0_5, %c1, %c0_6, %c0_7] : memref<1x8x128x64xbf16, #tpu.memory_space<vmem>>, vector<1x1x128x64xbf16>
    %5 = vector.shape_cast %4 : vector<1x1x128x64xbf16> to vector<128x64xbf16>
    %cst_8 = arith.constant dense<0.000000e+00> : vector<16x64xf32>
    %6 = tpu.matmul %0, %5, %cst_8 {dimension_numbers = #tpu.dot_dimension_numbers<[1], [0], [0], [1], [0, 0, 1, 1], [], []>} : vector<16x128xbf16>, vector<128x64xbf16>, vector<16x64xf32> -> vector<16x64xf32>
    %7 = arith.maximumf %3, %6 : vector<16x64xf32>
    %c0_9 = arith.constant 0 : index
    %c2 = arith.constant 2 : index
    %c0_10 = arith.constant 0 : index
    %c0_11 = arith.constant 0 : index
    %8 = vector.load %arg2[%c0_9, %c2, %c0_10, %c0_11] : memref<1x8x128x64xbf16, #tpu.memory_space<vmem>>, vector<1x1x128x64xbf16>
    %9 = vector.shape_cast %8 : vector<1x1x128x64xbf16> to vector<128x64xbf16>
    %cst_12 = arith.constant dense<0.000000e+00> : vector<16x64xf32>
    %10 = tpu.matmul %0, %9, %cst_12 {dimension_numbers = #tpu.dot_dimension_numbers<[1], [0], [0], [1], [0, 0, 1, 1], [], []>} : vector<16x128xbf16>, vector<128x64xbf16>, vector<16x64xf32> -> vector<16x64xf32>
    %11 = arith.maximumf %7, %10 : vector<16x64xf32>
    %c0_13 = arith.constant 0 : index
    %c3 = arith.constant 3 : index
    %c0_14 = arith.constant 0 : index
    %c0_15 = arith.constant 0 : index
    %12 = vector.load %arg2[%c0_13, %c3, %c0_14, %c0_15] : memref<1x8x128x64xbf16, #tpu.memory_space<vmem>>, vector<1x1x128x64xbf16>
    %13 = vector.shape_cast %12 : vector<1x1x128x64xbf16> to vector<128x64xbf16>
    %cst_16 = arith.constant dense<0.000000e+00> : vector<16x64xf32>
    %14 = tpu.matmul %0, %13, %cst_16 {dimension_numbers = #tpu.dot_dimension_numbers<[1], [0], [0], [1], [0, 0, 1, 1], [], []>} : vector<16x128xbf16>, vector<128x64xbf16>, vector<16x64xf32> -> vector<16x64xf32>
    %15 = arith.maximumf %11, %14 : vector<16x64xf32>
    %c0_17 = arith.constant 0 : index
    %c4 = arith.constant 4 : index
    %c0_18 = arith.constant 0 : index
    %c0_19 = arith.constant 0 : index
    %16 = vector.load %arg2[%c0_17, %c4, %c0_18, %c0_19] : memref<1x8x128x64xbf16, #tpu.memory_space<vmem>>, vector<1x1x128x64xbf16>
    %17 = vector.shape_cast %16 : vector<1x1x128x64xbf16> to vector<128x64xbf16>
    %cst_20 = arith.constant dense<0.000000e+00> : vector<16x64xf32>
    %18 = tpu.matmul %0, %17, %cst_20 {dimension_numbers = #tpu.dot_dimension_numbers<[1], [0], [0], [1], [0, 0, 1, 1], [], []>} : vector<16x128xbf16>, vector<128x64xbf16>, vector<16x64xf32> -> vector<16x64xf32>
    %19 = arith.maximumf %15, %18 : vector<16x64xf32>
    %c0_21 = arith.constant 0 : index
    %c5 = arith.constant 5 : index
    %c0_22 = arith.constant 0 : index
    %c0_23 = arith.constant 0 : index
    %20 = vector.load %arg2[%c0_21, %c5, %c0_22, %c0_23] : memref<1x8x128x64xbf16, #tpu.memory_space<vmem>>, vector<1x1x128x64xbf16>
    %21 = vector.shape_cast %20 : vector<1x1x128x64xbf16> to vector<128x64xbf16>
    %cst_24 = arith.constant dense<0.000000e+00> : vector<16x64xf32>
    %22 = tpu.matmul %0, %21, %cst_24 {dimension_numbers = #tpu.dot_dimension_numbers<[1], [0], [0], [1], [0, 0, 1, 1], [], []>} : vector<16x128xbf16>, vector<128x64xbf16>, vector<16x64xf32> -> vector<16x64xf32>
    %23 = arith.maximumf %19, %22 : vector<16x64xf32>
    %c0_25 = arith.constant 0 : index
    %c6 = arith.constant 6 : index
    %c0_26 = arith.constant 0 : index
    %c0_27 = arith.constant 0 : index
    %24 = vector.load %arg2[%c0_25, %c6, %c0_26, %c0_27] : memref<1x8x128x64xbf16, #tpu.memory_space<vmem>>, vector<1x1x128x64xbf16>
    %25 = vector.shape_cast %24 : vector<1x1x128x64xbf16> to vector<128x64xbf16>
    %cst_28 = arith.constant dense<0.000000e+00> : vector<16x64xf32>
    %26 = tpu.matmul %0, %25, %cst_28 {dimension_numbers = #tpu.dot_dimension_numbers<[1], [0], [0], [1], [0, 0, 1, 1], [], []>} : vector<16x128xbf16>, vector<128x64xbf16>, vector<16x64xf32> -> vector<16x64xf32>
    %27 = arith.maximumf %23, %26 : vector<16x64xf32>
    %c0_29 = arith.constant 0 : index
    %c7 = arith.constant 7 : index
    %c0_30 = arith.constant 0 : index
    %c0_31 = arith.constant 0 : index
    %28 = vector.load %arg2[%c0_29, %c7, %c0_30, %c0_31] : memref<1x8x128x64xbf16, #tpu.memory_space<vmem>>, vector<1x1x128x64xbf16>
    %29 = vector.shape_cast %28 : vector<1x1x128x64xbf16> to vector<128x64xbf16>
    %cst_32 = arith.constant dense<0.000000e+00> : vector<16x64xf32>
    %30 = tpu.matmul %0, %29, %cst_32 {dimension_numbers = #tpu.dot_dimension_numbers<[1], [0], [0], [1], [0, 0, 1, 1], [], []>} : vector<16x128xbf16>, vector<128x64xbf16>, vector<16x64xf32> -> vector<16x64xf32>
    %31 = arith.maximumf %27, %30 : vector<16x64xf32>
    %c0_33 = arith.constant 0 : index
    %c0_34 = arith.constant 0 : index
    %32 = vector.load %arg4[%c0_33, %c0_34] : memref<16x1xf32, #tpu.memory_space<vmem>>, vector<16x1xf32>
    %33 = vector.broadcast %32 : vector<16x1xf32> to vector<16x64xf32>
    %34 = arith.addf %31, %33 : vector<16x64xf32>
    %cst_35 = arith.constant dense<0xFF800000> : vector<64xf32>
    %35 = vector.multi_reduction <maximumf>, %34, %cst_35 [0] : vector<16x64xf32> to vector<64xf32>
    %36 = vector.shape_cast %35 : vector<64xf32> to vector<1x64xf32>
    %37 = vector.broadcast %36 : vector<1x64xf32> to vector<16x64xf32>
    %38 = arith.subf %34, %37 : vector<16x64xf32>
    %39 = math.exp %38 : vector<16x64xf32>
    %cst_36 = arith.constant dense<0.000000e+00> : vector<64xf32>
    %40 = vector.multi_reduction <add>, %39, %cst_36 [0] : vector<16x64xf32> to vector<64xf32>
    %41 = vector.shape_cast %40 : vector<64xf32> to vector<1x64xf32>
    %42 = math.log %41 : vector<1x64xf32>
    %43 = arith.addf %36, %42 : vector<1x64xf32>
    %cst_37 = arith.constant 0.000000e+00 : f32
    %44 = vector.broadcast %cst_37 : f32 to vector<1x64xf32>
    %45 = arith.maximumf %43, %44 : vector<1x64xf32>
    %c0_38 = arith.constant 0 : index
    %c0_39 = arith.constant 0 : index
    %c0_40 = arith.constant 0 : index
    %46 = vector.load %arg5[%c0_38, %c0_39, %c0_40] : memref<1x1x64xf32, #tpu.memory_space<vmem>>, vector<1x1x64xf32>
    %47 = vector.shape_cast %46 : vector<1x1x64xf32> to vector<1x64xf32>
    %48 = vector.shape_cast %45 : vector<1x64xf32> to vector<1x1x64xf32>
    tpu.vector_store %arg5[%c0_38, %c0_39, %c0_40], %48 {strides = array<i32>} : memref<1x1x64xf32, #tpu.memory_space<vmem>>, vector<1x1x64xf32>,
    return
  }
  func.func @transform_0(%arg0: i32, %arg1: i32) -> (i32, i32, i32, i32) {
    %c0_i32 = arith.constant 0 : i32
    %c0_i32_0 = arith.constant 0 : i32
    %c0_i32_1 = arith.constant 0 : i32
    return %arg0, %c0_i32, %c0_i32_0, %arg1 : i32, i32, i32, i32
  }
  func.func @transform_1(%arg0: i32, %arg1: i32) -> (i32, i32) {
    %c0_i32 = arith.constant 0 : i32
    %c0_i32_0 = arith.constant 0 : i32
    %c0_i32_1 = arith.constant 0 : i32
    return %c0_i32, %c0_i32_0 : i32, i32
  }
  func.func @transform_2(%arg0: i32, %arg1: i32) -> (i32, i32) {
    %c0_i32 = arith.constant 0 : i32
    %c0_i32_0 = arith.constant 0 : i32
    %c0_i32_1 = arith.constant 0 : i32
    return %c0_i32, %c0_i32_0 : i32, i32
  }
  func.func @transform_3(%arg0: i32, %arg1: i32) -> (i32, i32, i32) {
    %c0_i32 = arith.constant 0 : i32
    %c0_i32_0 = arith.constant 0 : i32
    return %arg0, %c0_i32, %arg1 : i32, i32, i32
  }
}

</mosaic_0001>

<bundles_post_ra>
// kernel: model_forward.1
= control target key start
LH: loop header
LB: loop body
LE: loop exit
PB: predicated region body
PF: predicated region fallthrough
CT: control target
= control target key end

     0   :  { %s1749_s12 = smov 0   ;;  %s1751_s13 = smov 0   ;;  %s1955_s0 = inlined_call_operand.vmem [shape: bf16[2,8,128,64], index: 0, kind: input, shape index: {}]   ;;  %s1956_s1 = inlined_call_operand.vmem [shape: bf16[16,128], index: 1, kind: input, shape index: {}]   ;;  %s1957_s2 = inlined_call_operand.vmem [shape: f32[16,1], index: 2, kind: input, shape index: {}]   ;;  %s1958_s3 = inlined_call_operand.vmem [shape: f32[2,1,64], index: 3, kind: output, shape index: {}]  }
   0x1   :  { %s1753_s14 = smov 0  }
   0x2 LB: > { %s25_s15 = sadd.s32 1, %s1720_s13  ;;  %p1188_p0 = scmp.ge.s32.totalorder %s1724_s14, 1  ;;  %s1724_s14 = sphi %s1753_s14, %s13_s14   ;;  %s1720_s13 = sphi %s1751_s13, %s1960_s13   ;;  %s1716_s12 = sphi %s1749_s12, %s1959_s12  }
   0x3   : > { %p27_p1 = scmp.ge.s32.totalorder %s25_s15, 2  ;;  %p156_p2 = scmp.lt.s32.totalorder %s1724_s14, 3 }
   0x5   : > { %s1962_s15 = smov (%p27_p1, %s25_s15), 0  ;;  %p157_p3 = pnand %p1188_p0, %p156_p2 }
   0x6   : > { %p184_p4 = scmp.lt.s32.totalorder (!%p157_p3), %s1716_s12, 1 }
   0x7   : > { %160 = sbr.rel (%p157_p3) target bundleno = 416 (0x1a0), region = 32 }
   0xc   : > { %v1726_v0 = vmov 0.0   ;;  %s1964_s12 = smov (!%p184_p4, %s1716_s12), 1  ;;  %vm1727_vm0 = vmmov 0   ;;  %v1728_v5 = vmov 0   ;;  %v1814_v18 = vld [vmem:[%s1956_s1] sm:$0xff]   ;;  %v1069_v39 = vld [vmem:[%s1957_s2 + $0x8] sm:$0xff] }
   0xd   : > { %1443 = vmatprep.subr.bf16.mxu0 %v1726_v0  ;;  %1463 = vmatprep.subr.bf16.mxu1 %v1726_v0  ;;  %s1370_s16 = sshll.u32 %s1964_s12, 9  ;;  %v1068_v37 = vld [vmem:[%s1957_s2] sm:$0xff]  ;;  %vm1082_vm1 = vcmask 523264   ;;  %s197_s28 = scalar_lea.vmem %s1958_s3, %s1964_s12  ;;  %vm1111_vm2 = vcmask 516096  }
   0xe   : > { %1459 = vmatprep.mubr.msk.bf16.mxu0 %vm1727_vm0, %v1726_v0  ;;  %1479 = vmatprep.mubr.msk.bf16.mxu1 %vm1727_vm0, %v1726_v0  ;;  %s1779_s19 = scalar_lea.vmem %s1955_s0, %s1370_s16 }
   0xf   : > { %v1631_v1 = vld [vmem:[%s1779_s19 + $0x38] sm:$0xff]   ;;  %v1633_v3 = vld [vmem:[%s1779_s19 + $0x30] sm:$0xff]   ;;  %1630 = vset.pattern.permute.xlu0 %v1728_v5  ;;  %v1635_v6 = vld [vmem:[%s1779_s19 + $0x28] sm:$0xff]  }
  0x10   : > { %v1632_v2 = vld [vmem:[%s1779_s19 + $0x78] sm:$0xff]   ;;  %1444 = vmatpush3.bf16.msra.mxu0 %v1631_v1  ;;  %v1634_v4 = vld [vmem:[%s1779_s19 + $0x70] sm:$0xff]   ;;  %v1636_v7 = vld [vmem:[%s1779_s19 + $0x68] sm:$0xff]   ;;  %1072 = vperm.xlu0 %1630, %v1068_v37  }
  0x11   : > { %1464 = vmatpush3.bf16.msra.mxu1 %v1632_v2  ;;  %1445 = vmatprep.subr.bf16.mxu0 %v1726_v0  ;;  %v1637_v8 = vld [vmem:[%s1779_s19 + $0x20] sm:$0xff]   ;;  %v1639_v10 = vld [vmem:[%s1779_s19 + $0x18] sm:$0xff]   ;;  %v1641_v12 = vld [vmem:[%s1779_s19 + $0x10] sm:$0xff]  }
  0x12   : > { %1465 = vmatprep.subr.bf16.mxu1 %v1726_v0  ;;  %v1638_v9 = vld [vmem:[%s1779_s19 + $0x60] sm:$0xff]   ;;  %v1640_v11 = vld [vmem:[%s1779_s19 + $0x58] sm:$0xff]   ;;  %v1642_v13 = vld [vmem:[%s1779_s19 + $0x50] sm:$0xff]  }
  0x13   : > { %v1643_v14 = vld [vmem:[%s1779_s19 + $0x8] sm:$0xff]   ;;  %v1645_v16 = vld [vmem:[%s1779_s19] sm:$0xff]   ;;  %v1648_v19 = vld [vmem:[%s1779_s19 + $0xb8] sm:$0xff]  }
  0x14   : > { %1446 = vmatpush3.bf16.msra.mxu0 %v1633_v3  ;;  %v1644_v15 = vld [vmem:[%s1779_s19 + $0x48] sm:$0xff]   ;;  %v1646_v17 = vld [vmem:[%s1779_s19 + $0x40] sm:$0xff]   ;;  %v1649_v20 = vld [vmem:[%s1779_s19 + $0xf8] sm:$0xff]   ;;  %1077 = vperm.xlu0 %1630, %v1069_v39  }
  0x15   : > { %1466 = vmatpush3.bf16.msra.mxu1 %v1634_v4  ;;  %1447 = vmatprep.subr.bf16.mxu0 %v1726_v0  ;;  %v1650_v21 = vld [vmem:[%s1779_s19 + $0xb0] sm:$0xff]   ;;  %v1652_v23 = vld [vmem:[%s1779_s19 + $0xa8] sm:$0xff]   ;;  %v1654_v25 = vld [vmem:[%s1779_s19 + $0xa0] sm:$0xff]  }
  0x16   : > { %1467 = vmatprep.subr.bf16.mxu1 %v1726_v0  ;;  %v1651_v22 = vld [vmem:[%s1779_s19 + $0xf0] sm:$0xff]   ;;  %v1653_v24 = vld [vmem:[%s1779_s19 + $0xe8] sm:$0xff]   ;;  %v1655_v26 = vld [vmem:[%s1779_s19 + $0xe0] sm:$0xff]  }
  0x17   : > { %v1656_v27 = vld [vmem:[%s1779_s19 + $0x98] sm:$0xff]   ;;  %v1658_v29 = vld [vmem:[%s1779_s19 + $0x90] sm:$0xff]   ;;  %v1660_v31 = vld [vmem:[%s1779_s19 + $0x88] sm:$0xff]  }
  0x18   : > { %1448 = vmatpush3.bf16.msra.mxu0 %v1635_v6  ;;  %v1657_v28 = vld [vmem:[%s1779_s19 + $0xd8] sm:$0xff]   ;;  %v1659_v30 = vld [vmem:[%s1779_s19 + $0xd0] sm:$0xff]   ;;  %v1661_v32 = vld [vmem:[%s1779_s19 + $0xc8] sm:$0xff]  }
  0x19   : > { %1468 = vmatpush3.bf16.msra.mxu1 %v1636_v7  ;;  %1449 = vmatprep.subr.bf16.mxu0 %v1726_v0  ;;  %v1662_v33 = vld [vmem:[%s1779_s19 + $0x80] sm:$0xff]   ;;  %v1664_v35 = vld [vmem:[%s1779_s19 + $0x138] sm:$0xff]   ;;  %v1666_v38 = vld [vmem:[%s1779_s19 + $0x130] sm:$0xff]  }
  0x1a   : > { %1469 = vmatprep.subr.bf16.mxu1 %v1726_v0  ;;  %v1663_v34 = vld [vmem:[%s1779_s19 + $0xc0] sm:$0xff]   ;;  %v1665_v36 = vld [vmem:[%s1779_s19 + $0x178] sm:$0xff]   ;;  %v1667_v40 = vld [vmem:[%s1779_s19 + $0x170] sm:$0xff]  }
  0x1b   : > { %v1668_v41 = vld [vmem:[%s1779_s19 + $0x128] sm:$0xff]   ;;  %v1670_v43 = vld [vmem:[%s1779_s19 + $0x120] sm:$0xff]   ;;  %v1672_v45 = vld [vmem:[%s1779_s19 + $0x118] sm:$0xff]  }
  0x1c   : > { %1450 = vmatpush3.bf16.msra.mxu0 %v1637_v8  ;;  %v1669_v42 = vld [vmem:[%s1779_s19 + $0x168] sm:$0xff]   ;;  %v1671_v44 = vld [vmem:[%s1779_s19 + $0x160] sm:$0xff]   ;;  %v1673_v46 = vld [vmem:[%s1779_s19 + $0x158] sm:$0xff]  }
  0x1d   : > { %1470 = vmatpush3.bf16.msra.mxu1 %v1638_v9  ;;  %1451 = vmatprep.subr.bf16.mxu0 %v1726_v0  ;;  %v1674_v47 = vld [vmem:[%s1779_s19 + $0x110] sm:$0xff]   ;;  %v1676_v49 = vld [vmem:[%s1779_s19 + $0x108] sm:$0xff]   ;;  %v1678_v51 = vld [vmem:[%s1779_s19 + $0x100] sm:$0xff]  }
  0x1e   : > { %1471 = vmatprep.subr.bf16.mxu1 %v1726_v0  ;;  %v1675_v48 = vld [vmem:[%s1779_s19 + $0x150] sm:$0xff]   ;;  %v1677_v50 = vld [vmem:[%s1779_s19 + $0x148] sm:$0xff]   ;;  %v1679_v52 = vld [vmem:[%s1779_s19 + $0x140] sm:$0xff]  }
  0x1f   : > { %v1680_v53 = vld [vmem:[%s1779_s19 + $0x1b8] sm:$0xff]   ;;  %v1682_v55 = vld [vmem:[%s1779_s19 + $0x1b0] sm:$0xff]   ;;  %v1684_v57 = vld [vmem:[%s1779_s19 + $0x1a8] sm:$0xff]  }
  0x20   : > { %1452 = vmatpush3.bf16.msra.mxu0 %v1639_v10  ;;  %v1681_v54 = vld [vmem:[%s1779_s19 + $0x1f8] sm:$0xff]   ;;  %v1683_v56 = vld [vmem:[%s1779_s19 + $0x1f0] sm:$0xff]   ;;  %v1685_v58 = vld [vmem:[%s1779_s19 + $0x1e8] sm:$0xff]  }
  0x21   : > { %1472 = vmatpush3.bf16.msra.mxu1 %v1640_v11  ;;  %1453 = vmatprep.subr.bf16.mxu0 %v1726_v0  ;;  %v1686_v59 = vld [vmem:[%s1779_s19 + $0x1a0] sm:$0xff]   ;;  %v1688_v61 = vld [vmem:[%s1779_s19 + $0x198] sm:$0xff]   ;;  %v1690_v63 = vld [vmem:[%s1779_s19 + $0x190] sm:$0xff]  }
  0x22   : > { %1473 = vmatprep.subr.bf16.mxu1 %v1726_v0  ;;  %v1687_v60 = vld [vmem:[%s1779_s19 + $0x1e0] sm:$0xff]   ;;  %v1689_v62 = vld [vmem:[%s1779_s19 + $0x1d8] sm:$0xff]   ;;  %v1691_v1 = vld [vmem:[%s1779_s19 + $0x1d0] sm:$0xff]  }
  0x23   : > { %v1692_v2 = vld [vmem:[%s1779_s19 + $0x188] sm:$0xff]   ;;  %v1694_v4 = vld [vmem:[%s1779_s19 + $0x180] sm:$0xff]  }
  0x24   : > { %1454 = vmatpush3.bf16.msra.mxu0 %v1641_v12  ;;  %v1693_v3 = vld [vmem:[%s1779_s19 + $0x1c8] sm:$0xff]   ;;  %v1695_v5 = vld [vmem:[%s1779_s19 + $0x1c0] sm:$0xff]  }
  0x25   : > { %1474 = vmatpush3.bf16.msra.mxu1 %v1642_v13  ;;  %1455 = vmatprep.subr.bf16.mxu0 %v1726_v0 }
  0x26   : > { %1475 = vmatprep.subr.bf16.mxu1 %v1726_v0 }
  0x28   : > { %1456 = vmatpush3.bf16.msra.mxu0 %v1643_v14 }
  0x29   : > { %1476 = vmatpush3.bf16.msra.mxu1 %v1644_v15  ;;  %1457 = vmatprep.subr.bf16.mxu0 %v1726_v0 }
  0x2a   : > { %1477 = vmatprep.subr.bf16.mxu1 %v1726_v0 }
  0x2c   : > { %1458 = vmatpush3.bf16.msra.mxu0 %v1645_v16 }
  0x2d   : > { %1478 = vmatpush3.bf16.msra.mxu1 %v1646_v17  ;;  %1483 = vmatprep.subr.bf16.mxu0 %v1726_v0 }
  0x2e   : > { %1503 = vmatprep.subr.bf16.mxu1 %v1726_v0 }
  0x2f   : > { %1460 = vmatmul.mubr.bf16.vlgmr.msra.gmra.mxu0 %v1814_v18 }
  0x30   : > { %1480 = vmatmul.mubr.bf16.vlgmr.msra.gmra.mxu1 %v1814_v18  ;;  %1484 = vmatpush3.bf16.msra.mxu0 %v1648_v19 }
  0x31   : > { %1504 = vmatpush3.bf16.msra.mxu1 %v1649_v20  ;;  %1485 = vmatprep.subr.bf16.mxu0 %v1726_v0 }
  0x32   : > { %1505 = vmatprep.subr.bf16.mxu1 %v1726_v0  ;;  %1499 = vmatprep.mubr.msk.bf16.mxu0 %vm1727_vm0, %v1726_v0 }
  0x33   : > { %1519 = vmatprep.mubr.msk.bf16.mxu1 %vm1727_vm0, %v1726_v0 }
  0x34   : > { %1486 = vmatpush3.bf16.msra.mxu0 %v1650_v21 }
  0x35   : > { %1506 = vmatpush3.bf16.msra.mxu1 %v1651_v22  ;;  %1487 = vmatprep.subr.bf16.mxu0 %v1726_v0 }
  0x36   : > { %1507 = vmatprep.subr.bf16.mxu1 %v1726_v0 }
  0x38   : > { %1488 = vmatpush3.bf16.msra.mxu0 %v1652_v23 }
  0x39   : > { %1508 = vmatpush3.bf16.msra.mxu1 %v1653_v24  ;;  %1489 = vmatprep.subr.bf16.mxu0 %v1726_v0 }
  0x3a   : > { %1509 = vmatprep.subr.bf16.mxu1 %v1726_v0 }
  0x3c   : > { %1490 = vmatpush3.bf16.msra.mxu0 %v1654_v25 }
  0x3d   : > { %1510 = vmatpush3.bf16.msra.mxu1 %v1655_v26  ;;  %1491 = vmatprep.subr.bf16.mxu0 %v1726_v0 }
  0x3e   : > { %1511 = vmatprep.subr.bf16.mxu1 %v1726_v0 }
  0x40   : > { %1492 = vmatpush3.bf16.msra.mxu0 %v1656_v27 }
  0x41   : > { %1512 = vmatpush3.bf16.msra.mxu1 %v1657_v28  ;;  %1493 = vmatprep.subr.bf16.mxu0 %v1726_v0 }
  0x42   : > { %1513 = vmatprep.subr.bf16.mxu1 %v1726_v0 }
  0x44   : > { %1494 = vmatpush3.bf16.msra.mxu0 %v1658_v29 }
  0x45   : > { %1514 = vmatpush3.bf16.msra.mxu1 %v1659_v30  ;;  %1495 = vmatprep.subr.bf16.mxu0 %v1726_v0 }
  0x46   : > { %1515 = vmatprep.subr.bf16.mxu1 %v1726_v0 }
  0x48   : > { %1496 = vmatpush3.bf16.msra.mxu0 %v1660_v31 }
  0x49   : > { %1516 = vmatpush3.bf16.msra.mxu1 %v1661_v32  ;;  %1497 = vmatprep.subr.bf16.mxu0 %v1726_v0 }
  0x4a   : > { %1517 = vmatprep.subr.bf16.mxu1 %v1726_v0 }
  0x4c   : > { %1498 = vmatpush3.bf16.msra.mxu0 %v1662_v33 }
  0x4d   : > { %1518 = vmatpush3.bf16.msra.mxu1 %v1663_v34  ;;  %1523 = vmatprep.subr.bf16.mxu0 %v1726_v0 }
  0x4e   : > { %1543 = vmatprep.subr.bf16.mxu1 %v1726_v0 }
  0x4f   : > { %1500 = vmatmul.mubr.bf16.vlgmr.msra.gmra.mxu0 %v1814_v18 }
  0x50   : > { %1520 = vmatmul.mubr.bf16.vlgmr.msra.gmra.mxu1 %v1814_v18  ;;  %1524 = vmatpush3.bf16.msra.mxu0 %v1664_v35 }
  0x51   : > { %1544 = vmatpush3.bf16.msra.mxu1 %v1665_v36  ;;  %1525 = vmatprep.subr.bf16.mxu0 %v1726_v0 }
  0x52   : > { %1545 = vmatprep.subr.bf16.mxu1 %v1726_v0  ;;  %1539 = vmatprep.mubr.msk.bf16.mxu0 %vm1727_vm0, %v1726_v0 }
  0x53   : > { %1559 = vmatprep.mubr.msk.bf16.mxu1 %vm1727_vm0, %v1726_v0 }
  0x54   : > { %1526 = vmatpush3.bf16.msra.mxu0 %v1666_v38 }
  0x55   : > { %1546 = vmatpush3.bf16.msra.mxu1 %v1667_v40  ;;  %1527 = vmatprep.subr.bf16.mxu0 %v1726_v0 }
  0x56   : > { %1547 = vmatprep.subr.bf16.mxu1 %v1726_v0 }
  0x58   : > { %1528 = vmatpush3.bf16.msra.mxu0 %v1668_v41 }
  0x59   : > { %1548 = vmatpush3.bf16.msra.mxu1 %v1669_v42  ;;  %1529 = vmatprep.subr.bf16.mxu0 %v1726_v0 }
  0x5a   : > { %1549 = vmatprep.subr.bf16.mxu1 %v1726_v0 }
  0x5c   : > { %1530 = vmatpush3.bf16.msra.mxu0 %v1670_v43 }
  0x5d   : > { %1550 = vmatpush3.bf16.msra.mxu1 %v1671_v44  ;;  %1531 = vmatprep.subr.bf16.mxu0 %v1726_v0 }
  0x5e   : > { %1551 = vmatprep.subr.bf16.mxu1 %v1726_v0 }
  0x60   : > { %1532 = vmatpush3.bf16.msra.mxu0 %v1672_v45 }
  0x61   : > { %1552 = vmatpush3.bf16.msra.mxu1 %v1673_v46  ;;  %1533 = vmatprep.subr.bf16.mxu0 %v1726_v0 }
  0x62   : > { %1553 = vmatprep.subr.bf16.mxu1 %v1726_v0 }
  0x64   : > { %1534 = vmatpush3.bf16.msra.mxu0 %v1674_v47 }
  0x65   : > { %1554 = vmatpush3.bf16.msra.mxu1 %v1675_v48  ;;  %1535 = vmatprep.subr.bf16.mxu0 %v1726_v0 }
  0x66   : > { %1555 = vmatprep.subr.bf16.mxu1 %v1726_v0 }
  0x68   : > { %1536 = vmatpush3.bf16.msra.mxu0 %v1676_v49 }
  0x69   : > { %1556 = vmatpush3.bf16.msra.mxu1 %v1677_v50  ;;  %1537 = vmatprep.subr.bf16.mxu0 %v1726_v0 }
  0x6a   : > { %1557 = vmatprep.subr.bf16.mxu1 %v1726_v0 }
  0x6c   : > { %1538 = vmatpush3.bf16.msra.mxu0 %v1678_v51 }
  0x6d   : > { %1558 = vmatpush3.bf16.msra.mxu1 %v1679_v52  ;;  %1563 = vmatprep.subr.bf16.mxu0 %v1726_v0 }
  0x6e   : > { %1583 = vmatprep.subr.bf16.mxu1 %v1726_v0 }
  0x6f   : > { %1540 = vmatmul.mubr.bf16.vlgmr.msra.gmra.mxu0 %v1814_v18 }
  0x70   : > { %1560 = vmatmul.mubr.bf16.vlgmr.msra.gmra.mxu1 %v1814_v18  ;;  %1564 = vmatpush3.bf16.msra.mxu0 %v1680_v53 }
  0x71   : > { %1584 = vmatpush3.bf16.msra.mxu1 %v1681_v54  ;;  %1565 = vmatprep.subr.bf16.mxu0 %v1726_v0 }
  0x72   : > { %1585 = vmatprep.subr.bf16.mxu1 %v1726_v0  ;;  %1579 = vmatprep.mubr.msk.bf16.mxu0 %vm1727_vm0, %v1726_v0 }
  0x73   : > { %1599 = vmatprep.mubr.msk.bf16.mxu1 %vm1727_vm0, %v1726_v0 }
  0x74   : > { %1566 = vmatpush3.bf16.msra.mxu0 %v1682_v55 }
  0x75   : > { %1586 = vmatpush3.bf16.msra.mxu1 %v1683_v56  ;;  %1567 = vmatprep.subr.bf16.mxu0 %v1726_v0 }
  0x76   : > { %1587 = vmatprep.subr.bf16.mxu1 %v1726_v0 }
  0x78   : > { %1568 = vmatpush3.bf16.msra.mxu0 %v1684_v57 }
  0x79   : > { %1588 = vmatpush3.bf16.msra.mxu1 %v1685_v58  ;;  %1569 = vmatprep.subr.bf16.mxu0 %v1726_v0 }
  0x7a   : > { %1589 = vmatprep.subr.bf16.mxu1 %v1726_v0 }
  0x7c   : > { %1570 = vmatpush3.bf16.msra.mxu0 %v1686_v59 }
  0x7d   : > { %1590 = vmatpush3.bf16.msra.mxu1 %v1687_v60  ;;  %1571 = vmatprep.subr.bf16.mxu0 %v1726_v0 }
  0x7e   : > { %1591 = vmatprep.subr.bf16.mxu1 %v1726_v0 }
  0x80   : > { %1572 = vmatpush3.bf16.msra.mxu0 %v1688_v61 }
  0x81   : > { %1592 = vmatpush3.bf16.msra.mxu1 %v1689_v62  ;;  %1573 = vmatprep.subr.bf16.mxu0 %v1726_v0 }
  0x82   : > { %1593 = vmatprep.subr.bf16.mxu1 %v1726_v0 }
  0x84   : > { %1574 = vmatpush3.bf16.msra.mxu0 %v1690_v63 }
  0x85   : > { %1594 = vmatpush3.bf16.msra.mxu1 %v1691_v1  ;;  %1575 = vmatprep.subr.bf16.mxu0 %v1726_v0 }
  0x86   : > { %1595 = vmatprep.subr.bf16.mxu1 %v1726_v0 }
  0x88   : > { %1576 = vmatpush3.bf16.msra.mxu0 %v1692_v2 }
  0x89   : > { %1596 = vmatpush3.bf16.msra.mxu1 %v1693_v3  ;;  %1577 = vmatprep.subr.bf16.mxu0 %v1726_v0 }
  0x8a   : > { %1597 = vmatprep.subr.bf16.mxu1 %v1726_v0 }
  0x8b   : > { %v1073_v41 = vpop.permute.xlu0 %1072 }
  0x8c   : > { %1578 = vmatpush3.bf16.msra.mxu0 %v1694_v4 }
  0x8d   : > { %1598 = vmatpush3.bf16.msra.mxu1 %v1695_v5 }
  0x8f   : > { %1580 = vmatmul.mubr.bf16.vlgmr.msra.gmra.mxu0 %v1814_v18  ;;  %v1078_v53 = vpop.permute.xlu0 %1077 }
  0x90   : > { %1600 = vmatmul.mubr.bf16.vlgmr.msra.gmra.mxu1 %v1814_v18 }
  0xef   : > { %v305_v6 = vpop.f32.mrf.mxu0 }
  0xf0   : > { %v411_v7 = vpop.f32.mrf.mxu1 }
  0xf1   : > { %v418_v8 = vmax.f32 %v305_v6, %v411_v7  ;;  %v1461_v9 = vpop.f32.mrf.mxu0 }
  0xf2   : > { %v1481_v10 = vpop.f32.mrf.mxu1 }
  0xf3   : > { %v308_v11 = vpop.f32.mrf.mxu0 }
  0xf4   : > { %v414_v12 = vpop.f32.mrf.mxu1 }
  0xf5   : > { %v419_v13 = vmax.f32 %v308_v11, %v414_v12  ;;  %v1462_v14 = vpop.f32.mrf.mxu0 }
  0xf6   : > { %v1482_v15 = vpop.f32.mrf.mxu1 }
 0x10f   : > { %v519_v16 = vpop.f32.mrf.mxu0 }
 0x110   : > { %v627_v17 = vpop.f32.mrf.mxu1  ;;  %v526_v31 = vmax.f32 %v418_v8, %v519_v16 }
 0x111   : > { %v1501_v19 = vpop.f32.mrf.mxu0 }
 0x112   : > { %v1521_v0 = vpop.f32.mrf.mxu1  ;;  %v634_v32 = vmax.f32 %v526_v31, %v627_v17 }
 0x113   : > { %v522_v20 = vpop.f32.mrf.mxu0 }
 0x114   : > { %v630_v21 = vpop.f32.mrf.mxu1  ;;  %v527_v33 = vmax.f32 %v419_v13, %v522_v20 }
 0x115   : > { %v1502_v22 = vpop.f32.mrf.mxu0 }
 0x116   : > { %v1522_v23 = vpop.f32.mrf.mxu1  ;;  %v635_v35 = vmax.f32 %v527_v33, %v630_v21 }
 0x12f   : > { %v735_v24 = vpop.f32.mrf.mxu0 }
 0x130   : > { %v843_v18 = vpop.f32.mrf.mxu1  ;;  %v742_v34 = vmax.f32 %v634_v32, %v735_v24 }
 0x131   : > { %v1541_v25 = vpop.f32.mrf.mxu0 }
 0x132   : > { %v1561_v26 = vpop.f32.mrf.mxu1  ;;  %v850_v36 = vmax.f32 %v742_v34, %v843_v18 }
 0x133   : > { %v738_v27 = vpop.f32.mrf.mxu0 }
 0x134   : > { %v846_v28 = vpop.f32.mrf.mxu1  ;;  %v743_v37 = vmax.f32 %v635_v35, %v738_v27 }
 0x135   : > { %v1542_v29 = vpop.f32.mrf.mxu0 }
 0x136   : > { %v1562_v30 = vpop.f32.mrf.mxu1  ;;  %v851_v43 = vmax.f32 %v743_v37, %v846_v28 }
 0x14f   : > { %v951_v38 = vpop.f32.mrf.mxu0 }
 0x150   : > { %v958_v39 = vmax.f32 %v850_v36, %v951_v38  ;;  %v1059_v40 = vpop.f32.mrf.mxu1 }
 0x151   : > { %v1581_v42 = vpop.f32.mrf.mxu0 }
 0x152   : > { %v1066_v44 = vmax.f32 %v958_v39, %v1059_v40  ;;  %v1601_v45 = vpop.f32.mrf.mxu1 }
 0x153   : > { %v954_v46 = vpop.f32.mrf.mxu0 }
 0x154   : > { %v959_v47 = vmax.f32 %v851_v43, %v954_v46  ;;  %v1062_v48 = vpop.f32.mrf.mxu1  ;;  %v1080_v50 = vadd.f32 %v1073_v41, %v1066_v44 }
 0x155   : > { %v1582_v49 = vpop.f32.mrf.mxu0 }
 0x156   : > { %v1067_v51 = vmax.f32 %v959_v47, %v1062_v48  ;;  %v1602_v52 = vpop.f32.mrf.mxu1  ;;  %v1083_v55 = vsel %vm1082_vm1, %v1080_v50, -inf }
 0x158   : > { %v1081_v54 = vadd.f32 %v1078_v53, %v1067_v51 }
 0x15a   : > { %v1084_v56 = vsel %vm1082_vm1, %v1081_v54, -inf }
 0x15b   : > { %v1085_v57 = vmax.f32 %v1083_v55, %v1084_v56 }
 0x15d   : > { %v1086_v58 = vrot.slane %v1085_v57, 4 }
 0x15f   : > { %v1087_v59 = vmax.f32 %v1085_v57, %v1086_v58 }
 0x161   : > { %v1088_v60 = vrot.slane %v1087_v59, 2 }
 0x163   : > { %v1089_v61 = vmax.f32 %v1087_v59, %v1088_v60 }
 0x165   : > { %v1090_v62 = vrot.slane %v1089_v61, 1 }
 0x167   : > { %v1091_v63 = vmax.f32 %v1089_v61, %v1090_v62 }
 0x169   : > { %v1092_v1 = vsub.f32 %v1080_v50, %v1091_v63  ;;  %v1093_v2 = vsub.f32 %v1081_v54, %v1091_v63 }
 0x16b   : > { %v1094_v3 = vmul.f32 1.442695, %v1092_v1  ;;  %v1096_v4 = vmul.f32 1.442695, %v1093_v2 }
 0x16d   : > { %1696 = vpow2.f32 %v1094_v3 }
 0x16e   : > { %1698 = vpow2.f32 %v1096_v4 }
 0x17a   : > { %v1697_v5 = vpop.eup %1696 }
 0x17b   : > { %v1699_v6 = vpop.eup %1698  ;;  %v1098_v7 = vsel %vm1082_vm1, %v1697_v5, 0.0 }
 0x17c   : > { %v1099_v8 = vsel %vm1082_vm1, %v1699_v6, 0.0 }
 0x17d   : > { %v1100_v9 = vadd.f32 %v1099_v8, %v1098_v7 }
 0x17f   : > { %v1101_v10 = vrot.slane %v1100_v9, 4 }
 0x181   : > { %v1102_v11 = vadd.f32 %v1101_v10, %v1100_v9 }
 0x183   : > { %v1103_v12 = vrot.slane %v1102_v11, 2 }
 0x185   : > { %v1104_v13 = vadd.f32 %v1103_v12, %v1102_v11 }
 0x187   : > { %v1105_v14 = vrot.slane %v1104_v13, 1 }
 0x189   : > { %v1106_v15 = vadd.f32 %v1105_v14, %v1104_v13 }
 0x18b   : > { %1700 = vlog2.f32 %v1106_v15 }
 0x198   : > { %v1701_v16 = vpop.eup %1700 }
 0x199   : > { %v1108_v17 = vmul.f32 0.6931472, %v1701_v16 }
 0x19b   : > { %v1109_v19 = vadd.f32 %v1108_v17, %v1091_v63 }
 0x19d   : > { %v1110_v0 = vmax.f32 %v1109_v19, 0.0 }
 0x19f   : > { %1112 = vst.msk [vmem:[%s197_s28] sm:$0x1] %vm1111_vm2, %v1110_v0 }
 0x1a0 PF: > { %s13_s14 = sadd.s32 1, %s1724_s14   ;;  %s1959_s12 = smov %s1720_s13 }
 0x1a1   : > { %p10_p5 = scmp.ge.s32.totalorder %s13_s14, 4   ;;  %s1960_s13 = smov %s1962_s15 }
 0x1a3   :  { %12 = sbr.rel (!%p10_p5) target bundleno = 2 (0x2), region = 69 }

</bundles_post_ra>
